<compile_context>
chip_gen: v7x
topology: tpu7x:2x2x1
jax: 0.10.0
libtpu: 0.0.40
codegen_flags: <defaults>
</compile_context>

<pallas_src>
import functools

import jax
import jax.numpy as jnp
from jax.experimental import pallas as pl
from jax.experimental.pallas import tpu as pltpu


def _fourconv_kernel(x_ref, w_ref, b_ref, o_ref, act_ref, *, H, L):
    """Fused (conv3x3 -> BN -> ReLU) * L for one batch element.

    x_ref:   (1, H, W*C)        input image as lane-dense row slabs
    w_ref:   (L, 3, W*C, W*C)   banded per-row weight matrices (bfloat16)
    b_ref:   (L, 1, W*C)        per-layer bias tiled over W (float32)
    o_ref:   (1, H, W*C)        output
    act_ref: (H+2, W*C)         VMEM-resident activation with 1-row zero halo
    """
    wc = act_ref.shape[1]
    # Zero the scratch once per batch element: rows 0 and H+1 become the
    # top/bottom conv zero padding; rows 1..H hold the current activation.
    act_ref[...] = jnp.zeros_like(act_ref)
    act_ref[1:1 + H, :] = x_ref[0]

    for l in range(L):  # static unroll over the layers
        acc = jnp.zeros((H, wc), jnp.float32)
        for kh in range(3):  # 3 kernel rows -> 3 (H,128)x(128,128) matmuls
            acc = acc + jnp.dot(
                act_ref[kh:kh + H, :].astype(jnp.bfloat16),
                w_ref[l, kh],
                preferred_element_type=jnp.float32,
            )
        y = jnp.maximum(acc + b_ref[l], 0.0)  # folded BN bias + ReLU (f32)
        if l < L - 1:
            act_ref[1:1 + H, :] = y           # activation stays in VMEM
        else:
            o_ref[0] = y.astype(o_ref.dtype)  # lane-dense (H, W*C) store


def fourconv_forward(x_nchw, w_all, b_all):
    """Run the fused FourConv forward pass.

    x_nchw: (N, Cin, H, W) float32 (PyTorch layout)
    w_all:  (L, 3, W*C, W*C) bfloat16 banded weights from pack_kernel_params
    b_all:  (L, 1, W*C) float32
    returns (N, Cout, H, W) float32
    """
    N, Cin, H, W = x_nchw.shape
    L = w_all.shape[0]
    WC = w_all.shape[-1]
    C = WC // W  # == out_channels

    # One-time input prep (cheap, NOT per layer): NCHW -> NHWC, pad channels
    # up to C with zeros, flatten to lane-dense (H, W*C) slabs.
    x = jnp.transpose(x_nchw, (0, 2, 3, 1)).astype(jnp.float32)
    if Cin < C:
        x = jnp.pad(x, ((0, 0), (0, 0), (0, 0), (0, C - Cin)))
    x_slab = x.reshape(N, H, WC)

    kernel = functools.partial(_fourconv_kernel, H=H, L=L)
    out = pl.pallas_call(
        kernel,
        out_shape=jax.ShapeDtypeStruct((N, H, WC), jnp.float32),
        grid_spec=pltpu.PrefetchScalarGridSpec(
            num_scalar_prefetch=0,
            grid=(N,),
            in_specs=[
                pl.BlockSpec((1, H, WC), lambda n: (n, 0, 0)),
                pl.BlockSpec((L, 3, WC, WC), lambda n: (0, 0, 0, 0)),
                pl.BlockSpec((L, 1, WC), lambda n: (0, 0, 0)),
            ],
            out_specs=pl.BlockSpec((1, H, WC), lambda n: (n, 0, 0)),
            scratch_shapes=[pltpu.VMEM((H + 2, WC), jnp.float32)],
        ),
        compiler_params=pltpu.CompilerParams(
            dimension_semantics=("parallel",)),
    )(x_slab, w_all, b_all)

    # (N, H, W*C) -> (N, H, W, C) is a free reshape; then back to NCHW.
    return jnp.transpose(out.reshape(N, H, W, C), (0, 3, 1, 2))


def make_fourconv_params(key, in_channels, out_channels, num_layers=4):
    """Deterministic Conv2d + BatchNorm2d parameters with the BN fold applied.

    Returns a list of per-layer dicts:
      w_fold: (3, 3, cin_l, out_channels) HWIO conv weights with the
              inference-mode BN scale folded in (w * gamma/sqrt(var+eps)).
      bias:   (out_channels,) folded bias (conv bias + BN shift).
    """
    eps = 1e-5
    params = []
    cin = in_channels
    for i in range(num_layers):
        k = jax.random.fold_in(key, i)
        kw_, kb, kg, kbe, km, kv = jax.random.split(k, 6)
        w = jax.random.normal(kw_, (3, 3, cin, out_channels), jnp.float32) * 0.1
        b = jax.random.normal(kb, (out_channels,), jnp.float32) * 0.1
        gamma = 1.0 + 0.1 * jax.random.normal(kg, (out_channels,), jnp.float32)
        beta = 0.1 * jax.random.normal(kbe, (out_channels,), jnp.float32)
        mean = 0.1 * jax.random.normal(km, (out_channels,), jnp.float32)
        var = 1.0 + 0.1 * jax.random.uniform(kv, (out_channels,), jnp.float32)
        scale = gamma * jax.lax.rsqrt(var + eps)
        params.append({
            "w_fold": w * scale,                # fold BN scale into weights
            "bias": scale * (b - mean) + beta,  # fold conv bias + BN shift
        })
        cin = out_channels
    return params


def pack_kernel_params(params, in_channels, out_channels, W):
    """Pack folded per-layer weights into banded MXU operands.

    For kernel row kh the banded matrix B of shape (W*C, W*Cout) satisfies
      B[wi*C + ci, wo*Cout + co] = w[kh, wi - wo + 1, ci, co]
    (zero when the column tap falls outside [0, 2]), so
      out_rows = sum_kh  act_rows(kh) @ B(kh)
    computes the full 3x3 conv: the kw taps, the channel contraction and the
    left/right zero padding (band clipping) are all inside one matmul.
    """
    # TODO(synk): packing for in_channels > out_channels is not implemented.
    assert in_channels <= out_channels
    C = out_channels
    # shift[kw, wi, wo] = 1  iff  wi == wo + kw - 1
    shift = jnp.stack(
        [jnp.eye(W, k=1 - kw, dtype=jnp.float32) for kw in range(3)])
    w_list, b_list = [], []
    for p in params:
        w = p["w_fold"]                                   # (3, 3, cin_l, Cout)
        cin_l = w.shape[2]
        w = jnp.pad(w, ((0, 0), (0, 0), (0, C - cin_l), (0, 0)))  # (3,3,C,Cout)
        band = jnp.einsum("hkio,kab->haibo", w, shift)    # (3, W, C, W, Cout)
        w_list.append(band.reshape(3, W * C, W * C))
        b_list.append(jnp.tile(p["bias"], W).reshape(1, W * C))
    w_all = jnp.stack(w_list).astype(jnp.bfloat16)        # (L, 3, W*C, W*C)
    b_all = jnp.stack(b_list).astype(jnp.float32)         # (L, 1, W*C)
    return w_all, b_all


def _reference_forward(x_nchw, params):
    """Pure-JAX reference using the same folded, bf16-cast parameters."""
    x = jnp.transpose(x_nchw, (0, 2, 3, 1)).astype(jnp.float32)  # NHWC
    for p in params:
        y = jax.lax.conv_general_dilated(
            x.astype(jnp.bfloat16),
            p["w_fold"].astype(jnp.bfloat16),
            window_strides=(1, 1),
            padding=((1, 1), (1, 1)),
            dimension_numbers=("NHWC", "HWIO", "NHWC"),
            preferred_element_type=jnp.float32,
        )
        x = jnp.maximum(y + p["bias"], 0.0)
    return jnp.transpose(x, (0, 3, 1, 2))


if __name__ == "__main__":
    key = jax.random.PRNGKey(0)
    kx, kp = jax.random.split(key)

    batch, in_channels, out_channels, H, W = 2, 4, 8, 16, 16
    x = jax.random.normal(kx, (batch, in_channels, H, W), jnp.float32)

    params = make_fourconv_params(kp, in_channels, out_channels)
    w_all, b_all = pack_kernel_params(params, in_channels, out_channels, W)

    out = jax.block_until_ready(fourconv_forward(x, w_all, b_all))
    ref = jax.block_until_ready(_reference_forward(x, params))

    assert out.shape == (batch, out_channels, H, W)
    assert jnp.allclose(out, ref, atol=1e-3, rtol=1e-3), (
        float(jnp.max(jnp.abs(out - ref))))

    print("KERNEL_OK")
</pallas_src>

<mosaic_0001>
module attributes {stable_mosaic.version = 11 : i64} {
  func.func @_fourconv_kernel(%arg0: i32, %arg1: memref<1x16x128xf32, #tpu.memory_space<vmem>>, %arg2: memref<4x3x128x128xbf16, #tpu.memory_space<vmem>>, %arg3: memref<4x1x128xf32, #tpu.memory_space<vmem>>, %arg4: memref<1x16x128xf32, #tpu.memory_space<vmem>>, %arg5: memref<18x128xf32, #tpu.memory_space<vmem>>) attributes {dimension_semantics = [#tpu.dimension_semantics<parallel>], iteration_bounds = array<i64: 2>, scalar_prefetch = 0 : i64, scratch_operands = 1 : i64, tpu.core_type = #tpu.core_type<tc>, window_params = [{transform_indices = @transform_0, window_bounds = array<i64: 1, 16, 128>}, {pipeline_mode = #tpu.pipeline_mode<synchronous>, transform_indices = @transform_1, window_bounds = array<i64: 4, 3, 128, 128>}, {pipeline_mode = #tpu.pipeline_mode<synchronous>, transform_indices = @transform_2, window_bounds = array<i64: 4, 1, 128>}, {transform_indices = @transform_3, window_bounds = array<i64: 1, 16, 128>}]} {
    %cst = arith.constant 0.000000e+00 : f32
    %0 = vector.broadcast %cst : f32 to vector<18x128xf32>
    %c0 = arith.constant 0 : index
    %c0_0 = arith.constant 0 : index
    %1 = vector.load %arg5[%c0, %c0_0] : memref<18x128xf32, #tpu.memory_space<vmem>>, vector<18x128xf32>
    tpu.vector_store %arg5[%c0, %c0_0], %0 {strides = array<i32>} : memref<18x128xf32, #tpu.memory_space<vmem>>, vector<18x128xf32>,
    %c0_1 = arith.constant 0 : index
    %c0_2 = arith.constant 0 : index
    %c0_3 = arith.constant 0 : index
    %2 = vector.load %arg1[%c0_1, %c0_2, %c0_3] : memref<1x16x128xf32, #tpu.memory_space<vmem>>, vector<1x16x128xf32>
    %3 = vector.shape_cast %2 : vector<1x16x128xf32> to vector<16x128xf32>
    %c1 = arith.constant 1 : index
    %c0_4 = arith.constant 0 : index
    %4 = vector.load %arg5[%c1, %c0_4] : memref<18x128xf32, #tpu.memory_space<vmem>>, vector<16x128xf32>
    tpu.vector_store %arg5[%c1, %c0_4], %3 {strides = array<i32>} : memref<18x128xf32, #tpu.memory_space<vmem>>, vector<16x128xf32>,
    %cst_5 = arith.constant 0.000000e+00 : f32
    %5 = vector.broadcast %cst_5 : f32 to vector<16x128xf32>
    %c0_6 = arith.constant 0 : index
    %c0_7 = arith.constant 0 : index
    %6 = vector.load %arg5[%c0_6, %c0_7] : memref<18x128xf32, #tpu.memory_space<vmem>>, vector<16x128xf32>
    %7 = arith.truncf %6 : vector<16x128xf32> to vector<16x128xbf16>
    %c0_8 = arith.constant 0 : index
    %c0_9 = arith.constant 0 : index
    %c0_10 = arith.constant 0 : index
    %c0_11 = arith.constant 0 : index
    %8 = vector.load %arg2[%c0_8, %c0_9, %c0_10, %c0_11] : memref<4x3x128x128xbf16, #tpu.memory_space<vmem>>, vector<1x1x128x128xbf16>
    %9 = vector.shape_cast %8 : vector<1x1x128x128xbf16> to vector<128x128xbf16>
    %cst_12 = arith.constant dense<0.000000e+00> : vector<16x128xf32>
    %10 = tpu.matmul %7, %9, %cst_12 {dimension_numbers = #tpu.dot_dimension_numbers<[1], [0], [0], [1], [0, 0, 1, 1], [], []>} : vector<16x128xbf16>, vector<128x128xbf16>, vector<16x128xf32> -> vector<16x128xf32>
    %11 = arith.addf %5, %10 : vector<16x128xf32>
    %c1_13 = arith.constant 1 : index
    %c0_14 = arith.constant 0 : index
    %12 = vector.load %arg5[%c1_13, %c0_14] : memref<18x128xf32, #tpu.memory_space<vmem>>, vector<16x128xf32>
    %13 = arith.truncf %12 : vector<16x128xf32> to vector<16x128xbf16>
    %c0_15 = arith.constant 0 : index
    %c1_16 = arith.constant 1 : index
    %c0_17 = arith.constant 0 : index
    %c0_18 = arith.constant 0 : index
    %14 = vector.load %arg2[%c0_15, %c1_16, %c0_17, %c0_18] : memref<4x3x128x128xbf16, #tpu.memory_space<vmem>>, vector<1x1x128x128xbf16>
    %15 = vector.shape_cast %14 : vector<1x1x128x128xbf16> to vector<128x128xbf16>
    %cst_19 = arith.constant dense<0.000000e+00> : vector<16x128xf32>
    %16 = tpu.matmul %13, %15, %cst_19 {dimension_numbers = #tpu.dot_dimension_numbers<[1], [0], [0], [1], [0, 0, 1, 1], [], []>} : vector<16x128xbf16>, vector<128x128xbf16>, vector<16x128xf32> -> vector<16x128xf32>
    %17 = arith.addf %11, %16 : vector<16x128xf32>
    %c2 = arith.constant 2 : index
    %c0_20 = arith.constant 0 : index
    %18 = vector.load %arg5[%c2, %c0_20] : memref<18x128xf32, #tpu.memory_space<vmem>>, vector<16x128xf32>
    %19 = arith.truncf %18 : vector<16x128xf32> to vector<16x128xbf16>
    %c0_21 = arith.constant 0 : index
    %c2_22 = arith.constant 2 : index
    %c0_23 = arith.constant 0 : index
    %c0_24 = arith.constant 0 : index
    %20 = vector.load %arg2[%c0_21, %c2_22, %c0_23, %c0_24] : memref<4x3x128x128xbf16, #tpu.memory_space<vmem>>, vector<1x1x128x128xbf16>
    %21 = vector.shape_cast %20 : vector<1x1x128x128xbf16> to vector<128x128xbf16>
    %cst_25 = arith.constant dense<0.000000e+00> : vector<16x128xf32>
    %22 = tpu.matmul %19, %21, %cst_25 {dimension_numbers = #tpu.dot_dimension_numbers<[1], [0], [0], [1], [0, 0, 1, 1], [], []>} : vector<16x128xbf16>, vector<128x128xbf16>, vector<16x128xf32> -> vector<16x128xf32>
    %23 = arith.addf %17, %22 : vector<16x128xf32>
    %c0_26 = arith.constant 0 : index
    %c0_27 = arith.constant 0 : index
    %c0_28 = arith.constant 0 : index
    %24 = vector.load %arg3[%c0_26, %c0_27, %c0_28] : memref<4x1x128xf32, #tpu.memory_space<vmem>>, vector<1x1x128xf32>
    %25 = vector.shape_cast %24 : vector<1x1x128xf32> to vector<1x128xf32>
    %26 = vector.broadcast %25 : vector<1x128xf32> to vector<16x128xf32>
    %27 = arith.addf %23, %26 : vector<16x128xf32>
    %cst_29 = arith.constant 0.000000e+00 : f32
    %28 = vector.broadcast %cst_29 : f32 to vector<16x128xf32>
    %29 = arith.maximumf %27, %28 : vector<16x128xf32>
    %c1_30 = arith.constant 1 : index
    %c0_31 = arith.constant 0 : index
    %30 = vector.load %arg5[%c1_30, %c0_31] : memref<18x128xf32, #tpu.memory_space<vmem>>, vector<16x128xf32>
    tpu.vector_store %arg5[%c1_30, %c0_31], %29 {strides = array<i32>} : memref<18x128xf32, #tpu.memory_space<vmem>>, vector<16x128xf32>,
    %cst_32 = arith.constant 0.000000e+00 : f32
    %31 = vector.broadcast %cst_32 : f32 to vector<16x128xf32>
    %c0_33 = arith.constant 0 : index
    %c0_34 = arith.constant 0 : index
    %32 = vector.load %arg5[%c0_33, %c0_34] : memref<18x128xf32, #tpu.memory_space<vmem>>, vector<16x128xf32>
    %33 = arith.truncf %32 : vector<16x128xf32> to vector<16x128xbf16>
    %c1_35 = arith.constant 1 : index
    %c0_36 = arith.constant 0 : index
    %c0_37 = arith.constant 0 : index
    %c0_38 = arith.constant 0 : index
    %34 = vector.load %arg2[%c1_35, %c0_36, %c0_37, %c0_38] : memref<4x3x128x128xbf16, #tpu.memory_space<vmem>>, vector<1x1x128x128xbf16>
    %35 = vector.shape_cast %34 : vector<1x1x128x128xbf16> to vector<128x128xbf16>
    %cst_39 = arith.constant dense<0.000000e+00> : vector<16x128xf32>
    %36 = tpu.matmul %33, %35, %cst_39 {dimension_numbers = #tpu.dot_dimension_numbers<[1], [0], [0], [1], [0, 0, 1, 1], [], []>} : vector<16x128xbf16>, vector<128x128xbf16>, vector<16x128xf32> -> vector<16x128xf32>
    %37 = arith.addf %31, %36 : vector<16x128xf32>
    %c1_40 = arith.constant 1 : index
    %c0_41 = arith.constant 0 : index
    %38 = vector.load %arg5[%c1_40, %c0_41] : memref<18x128xf32, #tpu.memory_space<vmem>>, vector<16x128xf32>
    %39 = arith.truncf %38 : vector<16x128xf32> to vector<16x128xbf16>
    %c1_42 = arith.constant 1 : index
    %c1_43 = arith.constant 1 : index
    %c0_44 = arith.constant 0 : index
    %c0_45 = arith.constant 0 : index
    %40 = vector.load %arg2[%c1_42, %c1_43, %c0_44, %c0_45] : memref<4x3x128x128xbf16, #tpu.memory_space<vmem>>, vector<1x1x128x128xbf16>
    %41 = vector.shape_cast %40 : vector<1x1x128x128xbf16> to vector<128x128xbf16>
    %cst_46 = arith.constant dense<0.000000e+00> : vector<16x128xf32>
    %42 = tpu.matmul %39, %41, %cst_46 {dimension_numbers = #tpu.dot_dimension_numbers<[1], [0], [0], [1], [0, 0, 1, 1], [], []>} : vector<16x128xbf16>, vector<128x128xbf16>, vector<16x128xf32> -> vector<16x128xf32>
    %43 = arith.addf %37, %42 : vector<16x128xf32>
    %c2_47 = arith.constant 2 : index
    %c0_48 = arith.constant 0 : index
    %44 = vector.load %arg5[%c2_47, %c0_48] : memref<18x128xf32, #tpu.memory_space<vmem>>, vector<16x128xf32>
    %45 = arith.truncf %44 : vector<16x128xf32> to vector<16x128xbf16>
    %c1_49 = arith.constant 1 : index
    %c2_50 = arith.constant 2 : index
    %c0_51 = arith.constant 0 : index
    %c0_52 = arith.constant 0 : index
    %46 = vector.load %arg2[%c1_49, %c2_50, %c0_51, %c0_52] : memref<4x3x128x128xbf16, #tpu.memory_space<vmem>>, vector<1x1x128x128xbf16>
    %47 = vector.shape_cast %46 : vector<1x1x128x128xbf16> to vector<128x128xbf16>
    %cst_53 = arith.constant dense<0.000000e+00> : vector<16x128xf32>
    %48 = tpu.matmul %45, %47, %cst_53 {dimension_numbers = #tpu.dot_dimension_numbers<[1], [0], [0], [1], [0, 0, 1, 1], [], []>} : vector<16x128xbf16>, vector<128x128xbf16>, vector<16x128xf32> -> vector<16x128xf32>
    %49 = arith.addf %43, %48 : vector<16x128xf32>
    %c1_54 = arith.constant 1 : index
    %c0_55 = arith.constant 0 : index
    %c0_56 = arith.constant 0 : index
    %50 = vector.load %arg3[%c1_54, %c0_55, %c0_56] : memref<4x1x128xf32, #tpu.memory_space<vmem>>, vector<1x1x128xf32>
    %51 = vector.shape_cast %50 : vector<1x1x128xf32> to vector<1x128xf32>
    %52 = vector.broadcast %51 : vector<1x128xf32> to vector<16x128xf32>
    %53 = arith.addf %49, %52 : vector<16x128xf32>
    %cst_57 = arith.constant 0.000000e+00 : f32
    %54 = vector.broadcast %cst_57 : f32 to vector<16x128xf32>
    %55 = arith.maximumf %53, %54 : vector<16x128xf32>
    %c1_58 = arith.constant 1 : index
    %c0_59 = arith.constant 0 : index
    %56 = vector.load %arg5[%c1_58, %c0_59] : memref<18x128xf32, #tpu.memory_space<vmem>>, vector<16x128xf32>
    tpu.vector_store %arg5[%c1_58, %c0_59], %55 {strides = array<i32>} : memref<18x128xf32, #tpu.memory_space<vmem>>, vector<16x128xf32>,
    %cst_60 = arith.constant 0.000000e+00 : f32
    %57 = vector.broadcast %cst_60 : f32 to vector<16x128xf32>
    %c0_61 = arith.constant 0 : index
    %c0_62 = arith.constant 0 : index
    %58 = vector.load %arg5[%c0_61, %c0_62] : memref<18x128xf32, #tpu.memory_space<vmem>>, vector<16x128xf32>
    %59 = arith.truncf %58 : vector<16x128xf32> to vector<16x128xbf16>
    %c2_63 = arith.constant 2 : index
    %c0_64 = arith.constant 0 : index
    %c0_65 = arith.constant 0 : index
    %c0_66 = arith.constant 0 : index
    %60 = vector.load %arg2[%c2_63, %c0_64, %c0_65, %c0_66] : memref<4x3x128x128xbf16, #tpu.memory_space<vmem>>, vector<1x1x128x128xbf16>
    %61 = vector.shape_cast %60 : vector<1x1x128x128xbf16> to vector<128x128xbf16>
    %cst_67 = arith.constant dense<0.000000e+00> : vector<16x128xf32>
    %62 = tpu.matmul %59, %61, %cst_67 {dimension_numbers = #tpu.dot_dimension_numbers<[1], [0], [0], [1], [0, 0, 1, 1], [], []>} : vector<16x128xbf16>, vector<128x128xbf16>, vector<16x128xf32> -> vector<16x128xf32>
    %63 = arith.addf %57, %62 : vector<16x128xf32>
    %c1_68 = arith.constant 1 : index
    %c0_69 = arith.constant 0 : index
    %64 = vector.load %arg5[%c1_68, %c0_69] : memref<18x128xf32, #tpu.memory_space<vmem>>, vector<16x128xf32>
    %65 = arith.truncf %64 : vector<16x128xf32> to vector<16x128xbf16>
    %c2_70 = arith.constant 2 : index
    %c1_71 = arith.constant 1 : index
    %c0_72 = arith.constant 0 : index
    %c0_73 = arith.constant 0 : index
    %66 = vector.load %arg2[%c2_70, %c1_71, %c0_72, %c0_73] : memref<4x3x128x128xbf16, #tpu.memory_space<vmem>>, vector<1x1x128x128xbf16>
    %67 = vector.shape_cast %66 : vector<1x1x128x128xbf16> to vector<128x128xbf16>
    %cst_74 = arith.constant dense<0.000000e+00> : vector<16x128xf32>
    %68 = tpu.matmul %65, %67, %cst_74 {dimension_numbers = #tpu.dot_dimension_numbers<[1], [0], [0], [1], [0, 0, 1, 1], [], []>} : vector<16x128xbf16>, vector<128x128xbf16>, vector<16x128xf32> -> vector<16x128xf32>
    %69 = arith.addf %63, %68 : vector<16x128xf32>
    %c2_75 = arith.constant 2 : index
    %c0_76 = arith.constant 0 : index
    %70 = vector.load %arg5[%c2_75, %c0_76] : memref<18x128xf32, #tpu.memory_space<vmem>>, vector<16x128xf32>
    %71 = arith.truncf %70 : vector<16x128xf32> to vector<16x128xbf16>
    %c2_77 = arith.constant 2 : index
    %c2_78 = arith.constant 2 : index
    %c0_79 = arith.constant 0 : index
    %c0_80 = arith.constant 0 : index
    %72 = vector.load %arg2[%c2_77, %c2_78, %c0_79, %c0_80] : memref<4x3x128x128xbf16, #tpu.memory_space<vmem>>, vector<1x1x128x128xbf16>
    %73 = vector.shape_cast %72 : vector<1x1x128x128xbf16> to vector<128x128xbf16>
    %cst_81 = arith.constant dense<0.000000e+00> : vector<16x128xf32>
    %74 = tpu.matmul %71, %73, %cst_81 {dimension_numbers = #tpu.dot_dimension_numbers<[1], [0], [0], [1], [0, 0, 1, 1], [], []>} : vector<16x128xbf16>, vector<128x128xbf16>, vector<16x128xf32> -> vector<16x128xf32>
    %75 = arith.addf %69, %74 : vector<16x128xf32>
    %c2_82 = arith.constant 2 : index
    %c0_83 = arith.constant 0 : index
    %c0_84 = arith.constant 0 : index
    %76 = vector.load %arg3[%c2_82, %c0_83, %c0_84] : memref<4x1x128xf32, #tpu.memory_space<vmem>>, vector<1x1x128xf32>
    %77 = vector.shape_cast %76 : vector<1x1x128xf32> to vector<1x128xf32>
    %78 = vector.broadcast %77 : vector<1x128xf32> to vector<16x128xf32>
    %79 = arith.addf %75, %78 : vector<16x128xf32>
    %cst_85 = arith.constant 0.000000e+00 : f32
    %80 = vector.broadcast %cst_85 : f32 to vector<16x128xf32>
    %81 = arith.maximumf %79, %80 : vector<16x128xf32>
    %c1_86 = arith.constant 1 : index
    %c0_87 = arith.constant 0 : index
    %82 = vector.load %arg5[%c1_86, %c0_87] : memref<18x128xf32, #tpu.memory_space<vmem>>, vector<16x128xf32>
    tpu.vector_store %arg5[%c1_86, %c0_87], %81 {strides = array<i32>} : memref<18x128xf32, #tpu.memory_space<vmem>>, vector<16x128xf32>,
    %cst_88 = arith.constant 0.000000e+00 : f32
    %83 = vector.broadcast %cst_88 : f32 to vector<16x128xf32>
    %c0_89 = arith.constant 0 : index
    %c0_90 = arith.constant 0 : index
    %84 = vector.load %arg5[%c0_89, %c0_90] : memref<18x128xf32, #tpu.memory_space<vmem>>, vector<16x128xf32>
    %85 = arith.truncf %84 : vector<16x128xf32> to vector<16x128xbf16>
    %c3 = arith.constant 3 : index
    %c0_91 = arith.constant 0 : index
    %c0_92 = arith.constant 0 : index
    %c0_93 = arith.constant 0 : index
    %86 = vector.load %arg2[%c3, %c0_91, %c0_92, %c0_93] : memref<4x3x128x128xbf16, #tpu.memory_space<vmem>>, vector<1x1x128x128xbf16>
    %87 = vector.shape_cast %86 : vector<1x1x128x128xbf16> to vector<128x128xbf16>
    %cst_94 = arith.constant dense<0.000000e+00> : vector<16x128xf32>
    %88 = tpu.matmul %85, %87, %cst_94 {dimension_numbers = #tpu.dot_dimension_numbers<[1], [0], [0], [1], [0, 0, 1, 1], [], []>} : vector<16x128xbf16>, vector<128x128xbf16>, vector<16x128xf32> -> vector<16x128xf32>
    %89 = arith.addf %83, %88 : vector<16x128xf32>
    %c1_95 = arith.constant 1 : index
    %c0_96 = arith.constant 0 : index
    %90 = vector.load %arg5[%c1_95, %c0_96] : memref<18x128xf32, #tpu.memory_space<vmem>>, vector<16x128xf32>
    %91 = arith.truncf %90 : vector<16x128xf32> to vector<16x128xbf16>
    %c3_97 = arith.constant 3 : index
    %c1_98 = arith.constant 1 : index
    %c0_99 = arith.constant 0 : index
    %c0_100 = arith.constant 0 : index
    %92 = vector.load %arg2[%c3_97, %c1_98, %c0_99, %c0_100] : memref<4x3x128x128xbf16, #tpu.memory_space<vmem>>, vector<1x1x128x128xbf16>
    %93 = vector.shape_cast %92 : vector<1x1x128x128xbf16> to vector<128x128xbf16>
    %cst_101 = arith.constant dense<0.000000e+00> : vector<16x128xf32>
    %94 = tpu.matmul %91, %93, %cst_101 {dimension_numbers = #tpu.dot_dimension_numbers<[1], [0], [0], [1], [0, 0, 1, 1], [], []>} : vector<16x128xbf16>, vector<128x128xbf16>, vector<16x128xf32> -> vector<16x128xf32>
    %95 = arith.addf %89, %94 : vector<16x128xf32>
    %c2_102 = arith.constant 2 : index
    %c0_103 = arith.constant 0 : index
    %96 = vector.load %arg5[%c2_102, %c0_103] : memref<18x128xf32, #tpu.memory_space<vmem>>, vector<16x128xf32>
    %97 = arith.truncf %96 : vector<16x128xf32> to vector<16x128xbf16>
    %c3_104 = arith.constant 3 : index
    %c2_105 = arith.constant 2 : index
    %c0_106 = arith.constant 0 : index
    %c0_107 = arith.constant 0 : index
    %98 = vector.load %arg2[%c3_104, %c2_105, %c0_106, %c0_107] : memref<4x3x128x128xbf16, #tpu.memory_space<vmem>>, vector<1x1x128x128xbf16>
    %99 = vector.shape_cast %98 : vector<1x1x128x128xbf16> to vector<128x128xbf16>
    %cst_108 = arith.constant dense<0.000000e+00> : vector<16x128xf32>
    %100 = tpu.matmul %97, %99, %cst_108 {dimension_numbers = #tpu.dot_dimension_numbers<[1], [0], [0], [1], [0, 0, 1, 1], [], []>} : vector<16x128xbf16>, vector<128x128xbf16>, vector<16x128xf32> -> vector<16x128xf32>
    %101 = arith.addf %95, %100 : vector<16x128xf32>
    %c3_109 = arith.constant 3 : index
    %c0_110 = arith.constant 0 : index
    %c0_111 = arith.constant 0 : index
    %102 = vector.load %arg3[%c3_109, %c0_110, %c0_111] : memref<4x1x128xf32, #tpu.memory_space<vmem>>, vector<1x1x128xf32>
    %103 = vector.shape_cast %102 : vector<1x1x128xf32> to vector<1x128xf32>
    %104 = vector.broadcast %103 : vector<1x128xf32> to vector<16x128xf32>
    %105 = arith.addf %101, %104 : vector<16x128xf32>
    %cst_112 = arith.constant 0.000000e+00 : f32
    %106 = vector.broadcast %cst_112 : f32 to vector<16x128xf32>
    %107 = arith.maximumf %105, %106 : vector<16x128xf32>
    %c0_113 = arith.constant 0 : index
    %c0_114 = arith.constant 0 : index
    %c0_115 = arith.constant 0 : index
    %108 = vector.load %arg4[%c0_113, %c0_114, %c0_115] : memref<1x16x128xf32, #tpu.memory_space<vmem>>, vector<1x16x128xf32>
    %109 = vector.shape_cast %108 : vector<1x16x128xf32> to vector<16x128xf32>
    %110 = vector.shape_cast %107 : vector<16x128xf32> to vector<1x16x128xf32>
    tpu.vector_store %arg4[%c0_113, %c0_114, %c0_115], %110 {strides = array<i32>} : memref<1x16x128xf32, #tpu.memory_space<vmem>>, vector<1x16x128xf32>,
    return
  }
  func.func @transform_0(%arg0: i32) -> (i32, i32, i32) {
    %c0_i32 = arith.constant 0 : i32
    %c0_i32_0 = arith.constant 0 : i32
    %c0_i32_1 = arith.constant 0 : i32
    return %arg0, %c0_i32, %c0_i32_0 : i32, i32, i32
  }
  func.func @transform_1(%arg0: i32) -> (i32, i32, i32, i32) {
    %c0_i32 = arith.constant 0 : i32
    %c0_i32_0 = arith.constant 0 : i32
    %c0_i32_1 = arith.constant 0 : i32
    %c0_i32_2 = arith.constant 0 : i32
    %c0_i32_3 = arith.constant 0 : i32
    return %c0_i32, %c0_i32_0, %c0_i32_1, %c0_i32_2 : i32, i32, i32, i32
  }
  func.func @transform_2(%arg0: i32) -> (i32, i32, i32) {
    %c0_i32 = arith.constant 0 : i32
    %c0_i32_0 = arith.constant 0 : i32
    %c0_i32_1 = arith.constant 0 : i32
    %c0_i32_2 = arith.constant 0 : i32
    return %c0_i32, %c0_i32_0, %c0_i32_1 : i32, i32, i32
  }
  func.func @transform_3(%arg0: i32) -> (i32, i32, i32) {
    %c0_i32 = arith.constant 0 : i32
    %c0_i32_0 = arith.constant 0 : i32
    %c0_i32_1 = arith.constant 0 : i32
    return %arg0, %c0_i32, %c0_i32_0 : i32, i32, i32
  }
}

</mosaic_0001>

<bundles_post_ra>
// kernel: tpu_custom_call.1
= control target key start
LH: loop header
LB: loop body
LE: loop exit
PB: predicated region body
PF: predicated region fallthrough
CT: control target
= control target key end

     0   :  { %8 = vsyncpa [#allocation4], 0  ;;  %s2814_s0 = inlined_call_operand.hbm [shape: f32[2,16,128], index: 0, kind: input, shape index: {}]   ;;  %s2815_s1 = inlined_call_operand.hbm [shape: bf16[4,3,128,128], index: 1, kind: input, shape index: {}]   ;;  %s2816_s2 = inlined_call_operand.vmem [shape: f32[4,1,128], index: 2, kind: input, shape index: {}]   ;;  %s2817_s3 = inlined_call_operand.hbm [shape: f32[2,16,128], index: 3, kind: output, shape index: {}]  }
   0x1   :  { %10 = vsyncpa [#allocation4 + $0x1], 0 }
   0x2   :  { %11 = vsyncpa [#allocation7], 0 }
   0x3   :  { %12 = vsyncpa [#allocation5], 0 }
   0x4   :  { %14 = vsyncpa [#allocation5 + $0x1], 0  ;;  %s2470_s12 = smov 0   ;;  %s2472_s13 = smov 0  }
   0x5   :  { %s2474_s14 = smov 0   ;;  %s2476_s15 = smov 0  }
   0x6 LB: > { %s2491_s16 = sadd.s32 4294967295, %s2437_s15   ;;  %s1679_s17 = sadd.s32 4294967294, %s2437_s15   ;;  %s2437_s15 = sphi %s2476_s15, %s2837_s15   ;;  %s2433_s14 = sphi %s2474_s14, %s2836_s14   ;;  %s2429_s13 = sphi %s2472_s13, %s2835_s13   ;;  %s2425_s12 = sphi %s2470_s12, %s2834_s12  }
   0x7   : > { %p40_p0 = scmp.ne.s32.totalorder %s2429_s13, %s2425_s12  ;;  %p2818_p1 = scmp.eq.s32.totalorder %s2491_s16, 0 }
   0x8   : > { %p112_p3 = scmp.eq.s32.totalorder %s1679_s17, 1  ;;  %p1680_p5 = scmp.ge.s32.totalorder %s2437_s15, 1 }
   0x9   : > { %p2500_p4 = por %p2818_p1, %p40_p0  ;;  %p119_p7 = scmp.lt.s32.totalorder %s2437_s15, 3 }
   0xa   : > { %p2505_p6 = por %p112_p3, %p40_p0  ;;  %s2439_s21 = smov [#allocation6]  }
   0xb   : > { %s2821_s18 = scalar_select %p2500_p4, 1, 0 }
   0xc   : > { %s2822_s19 = scalar_select %p2505_p6, 1, 0 }
   0xd   : > { %p2510_p8 = pnand %p1680_p5, %p119_p7  ;;  %s131_s22 = sshll.u32 %s2439_s21, 4  ;;  %s2514_s22 = int_to_ptr.vmem [resolvable:$true] %s131_s22 }
   0xe   : > { %s2526_s24 = sadd.s32 1, %s2437_s15   ;;  %s27_s25 = sadd.s32 1, %s2433_s14 }
   0xf   : > { %s2823_s20 = scalar_select %p2510_p8, 1, 0 }
  0x10   : > { %p2156_p9 = pneg %p2510_p8  ;;  %s24_s26 = ssub.s32 %s2437_s15, %s2526_s24 }
  0x11   : > { %s2309_s29 = scalar_lea.hbm %s2815_s1, 12288 }
  0x12   : > { %p2521_p11 = pnand %p2156_p9, %p2818_p1  ;;  %p2310_p12 = scmp.ne.s32.totalorder %s2815_s1, %s2309_s29 }
  0x13   : > { %p2316_p5 = scmp.lt.u32.totalorder %s2309_s29, %s2815_s1 }
  0x14   : > { %p2311_p13 = pneg %p2521_p11 }
  0x16   : > { %p2312_p0 = pnand %p2311_p13, %p2310_p12 }
  0x18   : > { %p2313_p3 = pneg %p2312_p0 }
  0x1a   : > { %p2318_p7 = pnand %p2316_p5, %p2313_p3 }
  0x1c   : > { %2321 = shalt.err (!%p2318_p7)
}
  0x1d   : > { %s2322_s7 = scalar_lea.vmem %s2514_s22, 12288  ;;  %p2330_p2 = scmp.lt.s32.totalorder %s2514_s22, %s2514_s22 }
  0x1e   : > { %p2323_p9 = scmp.ne.s32.totalorder %s2514_s22, %s2322_s7  ;;  %p2331_p6 = scmp.lt.s32.totalorder %s2322_s7, %s2322_s7 }
  0x20   : > { %p2325_p10 = pnand %p2323_p9, %p2311_p13  ;;  %p2332_p4 = por %p2331_p6, %p2330_p2 }
  0x22   : > { %p2326_p1 = pneg %p2325_p10 }
  0x24   : > { %p2333_p8 = pnand %p2332_p4, %p2326_p1 }
  0x26   : > { %2336 = shalt.err (!%p2333_p8)
}
  0x27   : > { %s2440_s8 = smov 64   ;;  %s2441_s9 = smov 4  }
  0x28   : > { %2159 = dma.hbm_to_vmem [thread:$0]  (!%p2521_p11), %s2815_s1, 12288, %s2514_s22, [#allocation7], %s2440_s8, %s2440_s8, %s2441_s9  }
  0x29   : > { %p25_p2 = scmp.eq.s32.totalorder %s24_s26, 0  ;;  %p34_p1 = scmp.ne.s32.totalorder %s2433_s14, %s2429_s13 }
  0x2a   : > { %p35_p4 = scmp.eq.s32.totalorder %s2437_s15, 0  ;;  %p2169_p6 = scmp.lt.s32.totalorder %s2437_s15, 2 }
  0x2b   : > { %s2557_s17 = scalar_select %p25_p2, %s2433_s14, %s27_s25  }
  0x2c   : > { %p36_p8 = por %p35_p4, %p34_p1  ;;  %p2825_p10 = scmp.eq.s32.totalorder %s2491_s16, 1 }
  0x2d   : > { %s148_s27 = sand.u32 1, %s2433_s14   ;;  %s1798_s28 = sshll.u32 %s2437_s15, 8 }
  0x2e   : > { %p2561_p12 = por %p2825_p10, %p34_p1  ;;  %s1683_s29 = sshll.u32 %s148_s27, 4 }
  0x2f   : > { %s2570_s4 = scalar_lea.hbm %s2814_s0, %s1798_s28  ;;  %s152_s22 = scalar_lea.vmem [#allocation3], %s1683_s29 }
  0x30   : > { %s159_s25 = sshll.u32 %s152_s22, 4  ;;  %p2572_p11 = pnand %p2169_p6, %p36_p8  ;;  %s2576_s25 = int_to_ptr.vmem [resolvable:$true] %s159_s25 }
  0x31   : > { %s2578_s5 = scalar_lea.sflag [#allocation4], %s148_s27  ;;  %s2337_s6 = scalar_lea.hbm %s2570_s4, 256 }
  0x32   : > { %p2338_p13 = scmp.ne.s32.totalorder %s2570_s4, %s2337_s6  ;;  %p2339_p0 = pneg %p2572_p11 }
  0x33   : > { %s2342_s9 = scalar_lea.hbm %s2814_s0, 512  ;;  %p2343_p7 = scmp.lt.u32.totalorder %s2570_s4, %s2814_s0 }
  0x34   : > { %p2340_p3 = pnand %p2339_p0, %p2338_p13  ;;  %p2344_p9 = scmp.lt.u32.totalorder %s2342_s9, %s2337_s6 }
  0x35   : > { %p2346_p1 = scmp.lt.u32.totalorder %s2337_s6, %s2570_s4 }
  0x36   : > { %p2341_p5 = pneg %p2340_p3  ;;  %p2345_p2 = por %p2344_p9, %p2343_p7 }
  0x38   : > { %p2347_p4 = por %p2346_p1, %p2345_p2 }
  0x3a   : > { %p2348_p6 = pnand %p2347_p4, %p2341_p5 }
  0x3c   : > { %2351 = shalt.err (!%p2348_p6)
}
  0x3d   : > { %s2352_s27 = scalar_lea.vmem %s2576_s25, 256  ;;  %s2442_s28 = smov [#allocation3]  }
  0x3e   : > { %p2353_p8 = scmp.ne.s32.totalorder %s2576_s25, %s2352_s27  ;;  %s2357_s29 = sshll.u32 %s2442_s28, 4  ;;  %s2358_s29 = int_to_ptr.vmem [resolvable:$false] %s2357_s29 }
  0x3f   : > { %s2359_s23 = scalar_lea.vmem %s2358_s29, 512  ;;  %p2360_p3 = scmp.lt.s32.totalorder %s2576_s25, %s2358_s29 }
  0x40   : > { %p2355_p10 = pnand %p2353_p8, %p2339_p0  ;;  %p2361_p7 = scmp.lt.s32.totalorder %s2359_s23, %s2352_s27 }
  0x42   : > { %p2356_p13 = pneg %p2355_p10  ;;  %p2362_p9 = por %p2361_p7, %p2360_p3 }
  0x44   : > { %p2363_p2 = pnand %p2362_p9, %p2356_p13 }
  0x46   : > { %2366 = shalt.err (!%p2363_p2)
}
  0x47   : > { %s2443_s30 = smov 128   ;;  %s2444_s22 = smov 8  }
  0x48   : > { %2163 = dma.hbm_to_vmem [thread:$0]  (!%p2572_p11), %s2570_s4, 256, %s2576_s25, %s2578_s5, %s2443_s30, %s2443_s30, %s2444_s22  }
  0x49   : > { %p2828_p0 = scmp.ne.s32.totalorder %s2823_s20, 0 }
  0x4a   : > { %s2609_s6 = sand.u32 (!%p2828_p0), 1, %s2429_s13   ;;  %p2829_p5 = scmp.ne.s32.totalorder (!%p2828_p0), %s2821_s18, 0 }
  0x4b   : > { %171 = sbr.rel (%p2828_p0) target bundleno = 1149 (0x47d), region = 32  ;;  %s1687_s7 = sshll.u32 (!%p2828_p0), %s2609_s6, 4 }
  0x4c   : > { %s174_s8 = scalar_lea.sflag (!%p2828_p0), [#allocation4], %s2609_s6  ;;  %s2615_s9 = scalar_lea.vmem (!%p2828_p0), [#allocation3], %s1687_s7 }
  0x52   : > { %2412 = dma.done.wait (%p2829_p5), %s174_s8, 256  }
  0x53   : > { %2414 = vsyncadd (%p2829_p5), %s174_s8, 4294967040  ;;  %p2830_p11 = scmp.eq.s32.totalorder %s2491_s16, 0 }
  0x55   : > { %2416 = dma.done.wait (%p2830_p11), [#allocation7], 12288   ;;  %p2831_p1 = pmov %p2830_p11 }
  0x56   : > { %v2445_v0 = vmov 0.0   ;;  %vm2446_vm0 = vmmov 0   ;;  %v2213_v1 = vld [vmem:[#allocation6 + $0x40] sm:$0xff]   ;;  %v2215_v3 = vld [vmem:[#allocation6 + $0x48] sm:$0xff]   ;;  %v2217_v5 = vld [vmem:[#allocation6 + $0x50] sm:$0xff]   ;;  %s203_s27 = scalar_lea.vmem [#allocation8], %s1687_s7 }
  0x57   : > { %2418 = vsyncadd (%p2831_p1), [#allocation7], 4294955008  ;;  %1908 = vmatprep.subr.bf16.mxu0 %v2445_v0  ;;  %205 = vst [vmem:[#allocation2] sm:$0xff] %v2445_v0  ;;  %1928 = vmatprep.subr.bf16.mxu1 %v2445_v0  ;;  %v2214_v2 = vld [vmem:[#allocation6] sm:$0xff]   ;;  %v2216_v4 = vld [vmem:[#allocation6 + $0x8] sm:$0xff]   ;;  %s1596_s28 = sshll.u32 %s203_s27, 4  ;;  %s2765_s28 = int_to_ptr.vmem [resolvable:$true] %s1596_s28 }
  0x58   : > { %206 = vst [vmem:[#allocation2 + $0x8] sm:$0xff] %v2445_v0  ;;  %207 = vst [vmem:[#allocation2 + $0x10] sm:$0x3] %v2445_v0  ;;  %1924 = vmatprep.mubr.msk.bf16.mxu0 %vm2446_vm0, %v2445_v0  ;;  %1944 = vmatprep.mubr.msk.bf16.mxu1 %vm2446_vm0, %v2445_v0  ;;  %v2218_v6 = vld [vmem:[#allocation6 + $0x10] sm:$0xff]   ;;  %v2219_v7 = vld [vmem:[#allocation6 + $0x58] sm:$0xff]   ;;  %s1799_s29 = sshll.u32 %s2491_s16, 8 }
  0x59   : > { %1909 = vmatpush3.bf16.msra.mxu0 %v2213_v1  ;;  %1929 = vmatpush3.bf16.msra.mxu1 %v2214_v2  ;;  %v2220_v8 = vld [vmem:[#allocation6 + $0x18] sm:$0xff]   ;;  %v2221_v9 = vld [vmem:[#allocation6 + $0x60] sm:$0xff]   ;;  %v2223_v13 = vld [vmem:[#allocation6 + $0x68] sm:$0xff]   ;;  %s2770_s22 = scalar_lea.hbm %s2817_s3, %s1799_s29  ;;  %s1583_s7 = scalar_lea.sflag [#allocation5], %s2609_s6 }
  0x5a   : > { %1910 = vmatprep.subr.bf16.mxu0 %v2445_v0  ;;  %1930 = vmatprep.subr.bf16.mxu1 %v2445_v0  ;;  %v2222_v10 = vld [vmem:[#allocation6 + $0x20] sm:$0xff]   ;;  %v209_v12 = vld [vmem:[%s2615_s9 + $0x8] sm:$0xff]  ;;  %v2225_v15 = vld [vmem:[#allocation6 + $0x70] sm:$0xff]   ;;  %s2367_s8 = scalar_lea.vmem %s2765_s28, 256  ;;  %s2447_s16 = smov [#allocation8]  }
  0x5b   : > { %v208_v11 = vld [vmem:[%s2615_s9] sm:$0xff]  ;;  %211 = vst [vmem:[#allocation2 + $0x9] sm:$0xff] %v209_v12  ;;  %v2224_v14 = vld [vmem:[#allocation6 + $0x28] sm:$0xff]   ;;  %v2227_v17 = vld [vmem:[#allocation6 + $0x78] sm:$0xff]   ;;  %p2368_p4 = scmp.ne.s32.totalorder %s2765_s28, %s2367_s8  ;;  %s2371_s9 = sshll.u32 %s2447_s16, 4  ;;  %s2372_s9 = int_to_ptr.vmem [resolvable:$false] %s2371_s9 }
  0x5c   : > { %210 = vst [vmem:[#allocation2 + $0x1] sm:$0xff] %v208_v11  ;;  %v2226_v16 = vld [vmem:[#allocation6 + $0x30] sm:$0xff]   ;;  %v2228_v18 = vld [vmem:[#allocation6 + $0x38] sm:$0xff]   ;;  %v2229_v21 = vld [vmem:[#allocation6 + $0x80] sm:$0xff]   ;;  %v233_v22 = vpack.c.bf16 %v209_v12, %v208_v11  ;;  %s2373_s18 = scalar_lea.vmem %s2372_s9, 512  ;;  %p2374_p10 = scmp.lt.s32.totalorder %s2765_s28, %s2372_s9 }
  0x5d   : > { %1911 = vmatpush3.bf16.msra.mxu0 %v2215_v3  ;;  %1931 = vmatpush3.bf16.msra.mxu1 %v2216_v4  ;;  %v2230_v24 = vld [vmem:[#allocation6 + $0x88] sm:$0xff]   ;;  %v2231_v25 = vld [vmem:[#allocation6 + $0x90] sm:$0xff]   ;;  %v2232_v26 = vld [vmem:[#allocation6 + $0x98] sm:$0xff]   ;;  %p2369_p6 = pnand %p2368_p4, %p2561_p12  ;;  %p2375_p13 = scmp.lt.s32.totalorder %s2373_s18, %s2367_s8 }
  0x5e   : > { %1912 = vmatprep.subr.bf16.mxu0 %v2445_v0  ;;  %1932 = vmatprep.subr.bf16.mxu1 %v2445_v0  ;;  %v2233_v27 = vld [vmem:[#allocation6 + $0xa0] sm:$0xff]   ;;  %v2234_v28 = vld [vmem:[#allocation6 + $0xa8] sm:$0xff]   ;;  %v2235_v29 = vld [vmem:[#allocation6 + $0xb0] sm:$0xff]  }
  0x5f   : > { %v2236_v30 = vld [vmem:[#allocation6 + $0xb8] sm:$0xff]   ;;  %v2237_v34 = vld [vmem:[#allocation6 + $0x100] sm:$0xff]   ;;  %v2239_v36 = vld [vmem:[#allocation6 + $0x108] sm:$0xff]   ;;  %p2370_p8 = pneg %p2369_p6  ;;  %p2376_p3 = por %p2375_p13, %p2374_p10 }
  0x60   : > { %v2238_v35 = vld [vmem:[#allocation6 + $0xc0] sm:$0xff]   ;;  %v2240_v37 = vld [vmem:[#allocation6 + $0xc8] sm:$0xff]   ;;  %v2241_v38 = vld [vmem:[#allocation6 + $0x110] sm:$0xff]  }
  0x61   : > { %1913 = vmatpush3.bf16.msra.mxu0 %v2217_v5  ;;  %1933 = vmatpush3.bf16.msra.mxu1 %v2218_v6  ;;  %v2242_v39 = vld [vmem:[#allocation6 + $0xd0] sm:$0xff]   ;;  %v2243_v40 = vld [vmem:[#allocation6 + $0x118] sm:$0xff]   ;;  %v2245_v41 = vld [vmem:[#allocation6 + $0x120] sm:$0xff]   ;;  %p2377_p7 = pnand %p2376_p3, %p2370_p8 }
  0x62   : > { %1914 = vmatprep.subr.bf16.mxu0 %v2445_v0  ;;  %1934 = vmatprep.subr.bf16.mxu1 %v2445_v0  ;;  %v430_v32 = vld [vmem:[#allocation2 + $0xa] sm:$0xff]  ;;  %v2247_v42 = vld [vmem:[#allocation6 + $0x128] sm:$0xff]   ;;  %v2246_v45 = vld [vmem:[#allocation6 + $0xe0] sm:$0xff]  }
  0x63   : > { %v212_v19 = vld [vmem:[#allocation2] sm:$0xff]  ;;  %v213_v20 = vld [vmem:[#allocation2 + $0x8] sm:$0xff]  ;;  %v2244_v43 = vld [vmem:[#allocation6 + $0xd8] sm:$0xff]  }
  0x64   : > { %v214_v23 = vpack.c.bf16 %v213_v20, %v212_v19  ;;  %v429_v31 = vld [vmem:[#allocation2 + $0x2] sm:$0xff]  ;;  %v2251_v46 = vld [vmem:[#allocation6 + $0x138] sm:$0xff]   ;;  %v1714_v61 = vld [vmem:[%s2816_s2] ss:$0 sm:$0xff] }
  0x65   : > { %1915 = vmatpush3.bf16.msra.mxu0 %v2219_v7  ;;  %1935 = vmatpush3.bf16.msra.mxu1 %v2220_v8  ;;  %v431_v33 = vpack.c.bf16 %v430_v32, %v429_v31  ;;  %v2249_v44 = vld [vmem:[#allocation6 + $0x130] sm:$0xff]   ;;  %v2248_v47 = vld [vmem:[#allocation6 + $0xe8] sm:$0xff]   ;;  %v2252_v49 = vld [vmem:[#allocation6 + $0xf8] sm:$0xff]  }
  0x66   : > { %1916 = vmatprep.subr.bf16.mxu0 %v2445_v0  ;;  %1936 = vmatprep.subr.bf16.mxu1 %v2445_v0  ;;  %v2250_v48 = vld [vmem:[#allocation6 + $0xf0] sm:$0xff]   ;;  %v2253_v8 = vld [vmem:[#allocation6 + $0x140] sm:$0xff]   ;;  %v2260_v19 = vld [vmem:[#allocation6 + $0x178] sm:$0xff]  }
  0x67   : > { %v2271_v31 = vld [vmem:[#allocation6 + $0x1e8] sm:$0xff]   ;;  %v2268_v32 = vld [vmem:[#allocation6 + $0x198] sm:$0xff]  }
  0x69   : > { %1917 = vmatpush3.bf16.msra.mxu0 %v2221_v9  ;;  %1937 = vmatpush3.bf16.msra.mxu1 %v2222_v10  ;;  %v2254_v10 = vld [vmem:[#allocation6 + $0x148] sm:$0xff]  }
  0x6a   : > { %1918 = vmatprep.subr.bf16.mxu0 %v2445_v0  ;;  %1938 = vmatprep.subr.bf16.mxu1 %v2445_v0 }
  0x6d   : > { %1919 = vmatpush3.bf16.msra.mxu0 %v2223_v13  ;;  %1939 = vmatpush3.bf16.msra.mxu1 %v2224_v14  ;;  %v2255_v13 = vld [vmem:[#allocation6 + $0x150] sm:$0xff]  }
  0x6e   : > { %1920 = vmatprep.subr.bf16.mxu0 %v2445_v0  ;;  %1940 = vmatprep.subr.bf16.mxu1 %v2445_v0 }
  0x71   : > { %1921 = vmatpush3.bf16.msra.mxu0 %v2225_v15  ;;  %1941 = vmatpush3.bf16.msra.mxu1 %v2226_v16  ;;  %v2256_v15 = vld [vmem:[#allocation6 + $0x158] sm:$0xff]   ;;  %v2257_v16 = vld [vmem:[#allocation6 + $0x160] sm:$0xff]  }
  0x72   : > { %1922 = vmatprep.subr.bf16.mxu0 %v2445_v0  ;;  %1942 = vmatprep.subr.bf16.mxu1 %v2445_v0 }
  0x75   : > { %1923 = vmatpush3.bf16.msra.mxu0 %v2227_v17  ;;  %1943 = vmatpush3.bf16.msra.mxu1 %v2228_v18  ;;  %v2258_v17 = vld [vmem:[#allocation6 + $0x168] sm:$0xff]   ;;  %v2259_v18 = vld [vmem:[#allocation6 + $0x170] sm:$0xff]  }
  0x76   : > { %1948 = vmatprep.subr.bf16.mxu0 %v2445_v0  ;;  %1968 = vmatprep.subr.bf16.mxu1 %v2445_v0 }
  0x78   : > { %1925 = vmatmul.mubr.bf16.vlgmr.msra.gmra.mrb[0].mxu0 %v233_v22  ;;  %1945 = vmatmul.mubr.bf16.vlgmr.msra.gmra.mrb[0].mxu1 %v214_v23  ;;  %v2261_v23 = vld [vmem:[#allocation6 + $0x1c0] sm:$0xff]  }
  0x79   : > { %1949 = vmatpush3.bf16.msra.mxu0 %v2229_v21  ;;  %1964 = vmatprep.mubr.msk.bf16.mxu0 %vm2446_vm0, %v2445_v0 }
  0x7a   : > { %1950 = vmatprep.subr.bf16.mxu0 %v2445_v0  ;;  %1984 = vmatprep.mubr.msk.bf16.mxu1 %vm2446_vm0, %v2445_v0 }
  0x7b   : > { %1969 = vmatpush3.bf16.msra.mxu1 %v2237_v34  ;;  %v2270_v34 = vld [vmem:[#allocation6 + $0x1a0] sm:$0xff]  }
  0x7c   : > { %1970 = vmatprep.subr.bf16.mxu1 %v2445_v0 }
  0x7d   : > { %1951 = vmatpush3.bf16.msra.mxu0 %v2230_v24  ;;  %v2262_v24 = vld [vmem:[#allocation6 + $0x180] sm:$0xff]  }
  0x7e   : > { %1952 = vmatprep.subr.bf16.mxu0 %v2445_v0 }
  0x7f   : > { %1971 = vmatpush3.bf16.msra.mxu1 %v2239_v36  ;;  %v2272_v36 = vld [vmem:[#allocation6 + $0x1a8] sm:$0xff]  }
  0x80   : > { %1972 = vmatprep.subr.bf16.mxu1 %v2445_v0 }
  0x81   : > { %1953 = vmatpush3.bf16.msra.mxu0 %v2231_v25  ;;  %v2263_v25 = vld [vmem:[#allocation6 + $0x1c8] sm:$0xff]  }
  0x82   : > { %1954 = vmatprep.subr.bf16.mxu0 %v2445_v0 }
  0x83   : > { %1973 = vmatpush3.bf16.msra.mxu1 %v2241_v38  ;;  %v2276_v38 = vld [vmem:[#allocation6 + $0x1b8] sm:$0xff]  }
  0x84   : > { %1974 = vmatprep.subr.bf16.mxu1 %v2445_v0 }
  0x85   : > { %1955 = vmatpush3.bf16.msra.mxu0 %v2232_v26  ;;  %v2264_v26 = vld [vmem:[#allocation6 + $0x188] sm:$0xff]  }
  0x86   : > { %1956 = vmatprep.subr.bf16.mxu0 %v2445_v0 }
  0x87   : > { %1975 = vmatpush3.bf16.msra.mxu1 %v2243_v40 }
  0x88   : > { %1976 = vmatprep.subr.bf16.mxu1 %v2445_v0 }
  0x89   : > { %1957 = vmatpush3.bf16.msra.mxu0 %v2233_v27  ;;  %v2265_v27 = vld [vmem:[#allocation6 + $0x1d0] sm:$0xff]  }
  0x8a   : > { %1958 = vmatprep.subr.bf16.mxu0 %v2445_v0 }
  0x8b   : > { %1977 = vmatpush3.bf16.msra.mxu1 %v2245_v41 }
  0x8c   : > { %1978 = vmatprep.subr.bf16.mxu1 %v2445_v0 }
  0x8d   : > { %1959 = vmatpush3.bf16.msra.mxu0 %v2234_v28  ;;  %v2266_v28 = vld [vmem:[#allocation6 + $0x190] sm:$0xff]  }
  0x8e   : > { %1960 = vmatprep.subr.bf16.mxu0 %v2445_v0 }
  0x8f   : > { %1979 = vmatpush3.bf16.msra.mxu1 %v2247_v42 }
  0x90   : > { %1980 = vmatprep.subr.bf16.mxu1 %v2445_v0 }
  0x91   : > { %1961 = vmatpush3.bf16.msra.mxu0 %v2235_v29  ;;  %v2267_v29 = vld [vmem:[#allocation6 + $0x1d8] sm:$0xff]  }
  0x92   : > { %1962 = vmatprep.subr.bf16.mxu0 %v2445_v0 }
  0x93   : > { %1981 = vmatpush3.bf16.msra.mxu1 %v2249_v44 }
  0x94   : > { %1982 = vmatprep.subr.bf16.mxu1 %v2445_v0 }
  0x95   : > { %1963 = vmatpush3.bf16.msra.mxu0 %v2236_v30  ;;  %v2269_v30 = vld [vmem:[#allocation6 + $0x1e0] sm:$0xff]  }
  0x96   : > { %1988 = vmatprep.subr.bf16.mxu0 %v2445_v0 }
  0x97   : > { %1983 = vmatpush3.bf16.msra.mxu1 %v2251_v46 }
  0x98   : > { %1965 = vmatmul.mubr.bf16.vlgmr.msra.gmra.mrb[4].mxu0 %v431_v33  ;;  %2008 = vmatprep.subr.bf16.mxu1 %v2445_v0  ;;  %v2273_v33 = vld [vmem:[#allocation6 + $0x1f0] sm:$0xff]  }
  0x99   : > { %2004 = vmatprep.mubr.msk.bf16.mxu0 %vm2446_vm0, %v2445_v0  ;;  %1989 = vmatpush3.bf16.msra.mxu0 %v2238_v35  ;;  %v2275_v35 = vld [vmem:[#allocation6 + $0x1f8] sm:$0xff]  }
  0x9a   : > { %1990 = vmatprep.subr.bf16.mxu0 %v2445_v0 }
  0x9d   : > { %1991 = vmatpush3.bf16.msra.mxu0 %v2240_v37  ;;  %v2274_v37 = vld [vmem:[#allocation6 + $0x1b0] sm:$0xff]  }
  0x9e   : > { %1992 = vmatprep.subr.bf16.mxu0 %v2445_v0 }
  0xa1   : > { %1993 = vmatpush3.bf16.msra.mxu0 %v2242_v39 }
  0xa2   : > { %1994 = vmatprep.subr.bf16.mxu0 %v2445_v0 }
  0xa5   : > { %1995 = vmatpush3.bf16.msra.mxu0 %v2244_v43 }
  0xa6   : > { %1996 = vmatprep.subr.bf16.mxu0 %v2445_v0 }
  0xa9   : > { %1997 = vmatpush3.bf16.msra.mxu0 %v2246_v45 }
  0xaa   : > { %1998 = vmatprep.subr.bf16.mxu0 %v2445_v0 }
  0xad   : > { %1999 = vmatpush3.bf16.msra.mxu0 %v2248_v47 }
  0xae   : > { %2000 = vmatprep.subr.bf16.mxu0 %v2445_v0 }
  0xb1   : > { %2001 = vmatpush3.bf16.msra.mxu0 %v2250_v48 }
  0xb2   : > { %2002 = vmatprep.subr.bf16.mxu0 %v2445_v0 }
  0xb5   : > { %2003 = vmatpush3.bf16.msra.mxu0 %v2252_v49 }
  0xb6   : > { %2028 = vmatprep.subr.bf16.mxu0 %v2445_v0 }
 0x14b   : > { %v333_v50 = vpop.f32.mrb[0].mxu0  ;;  %v422_v51 = vpop.f32.mrb[0].mxu1 }
 0x14c   : > { %v1926_v52 = vpop.f32.mrb[1].mxu0  ;;  %v423_v53 = vadd.f32 %v422_v51, %v333_v50  ;;  %v1946_v54 = vpop.f32.mrb[1].mxu1  ;;  %v1740_v50 = vld [vmem:[%s2816_s2 + $0x1] ss:$0 sm:$0xff] }
 0x14d   : > { %v336_v55 = vpop.f32.mrb[2].mxu0  ;;  %v425_v56 = vpop.f32.mrb[2].mxu1 }
 0x14e   : > { %v1927_v57 = vpop.f32.mrb[3].mxu0  ;;  %v426_v58 = vadd.f32 %v425_v56, %v336_v55  ;;  %v1947_v59 = vpop.f32.mrb[3].mxu1 }
 0x16b   : > { %v531_v60 = vpop.f32.mrb[4].mxu0 }
 0x16c   : > { %v538_v62 = vadd.f32 %v531_v60, %v423_v53  ;;  %v1966_v63 = vpop.f32.mrb[5].mxu0  ;;  %v2277_v60 = vld [vmem:[#allocation6 + $0x200] sm:$0xff]  }
 0x16d   : > { %v534_v1 = vpop.f32.mrb[6].mxu0 }
 0x16e   : > { %v547_v2 = vadd.f32 %v1714_v61, %v538_v62  ;;  %v539_v3 = vadd.f32 %v534_v1, %v426_v58  ;;  %v1967_v4 = vpop.f32.mrb[7].mxu0  ;;  %v2278_v62 = vld [vmem:[#allocation6 + $0x208] sm:$0xff]  }
 0x16f   : > { %v2280_v4 = vld [vmem:[#allocation6 + $0x218] sm:$0xff]  }
 0x170   : > { %v549_v5 = vmax.f32 %v547_v2, 0.0  ;;  %v548_v6 = vadd.f32 %v1714_v61, %v539_v3  ;;  %v2279_v2 = vld [vmem:[#allocation6 + $0x210] sm:$0xff]  }
 0x172   : > { %551 = vst [vmem:[#allocation2 + $0x1] sm:$0xff] %v549_v5  ;;  %v550_v7 = vmax.f32 %v548_v6, 0.0  ;;  %v2282_v6 = vld [vmem:[#allocation6 + $0x228] sm:$0xff]  }
 0x174   : > { %552 = vst [vmem:[#allocation2 + $0x9] sm:$0xff] %v550_v7  ;;  %v575_v9 = vpack.c.bf16 %v550_v7, %v549_v5  ;;  %v2281_v5 = vld [vmem:[#allocation6 + $0x220] sm:$0xff]   ;;  %v2283_v7 = vld [vmem:[#allocation6 + $0x230] sm:$0xff]  }
 0x176   : > { %1985 = vmatmul.mubr.bf16.vlgmr.msra.gmra.mrb[4].mxu1 %v575_v9 }
 0x177   : > { %2009 = vmatpush3.bf16.msra.mxu1 %v2253_v8  ;;  %2024 = vmatprep.mubr.msk.bf16.mxu1 %vm2446_vm0, %v2445_v0  ;;  %v2284_v8 = vld [vmem:[#allocation6 + $0x238] sm:$0xff]  }
 0x178   : > { %2010 = vmatprep.subr.bf16.mxu1 %v2445_v0 }
 0x179   : > { %v553_v11 = vld [vmem:[#allocation2] sm:$0xff] }
 0x17b   : > { %v554_v12 = vld [vmem:[#allocation2 + $0x8] sm:$0xff]  ;;  %2011 = vmatpush3.bf16.msra.mxu1 %v2254_v10 }
 0x17c   : > { %v555_v14 = vpack.c.bf16 %v554_v12, %v553_v11  ;;  %2012 = vmatprep.subr.bf16.mxu1 %v2445_v0  ;;  %v771_v20 = vld [vmem:[#allocation2 + $0x2] sm:$0xff]  ;;  %v772_v21 = vld [vmem:[#allocation2 + $0xa] sm:$0xff]  ;;  %v2285_v12 = vld [vmem:[#allocation6 + $0x280] sm:$0xff]  }
 0x17d   : > { %v773_v22 = vpack.c.bf16 %v772_v21, %v771_v20  ;;  %v2295_v20 = vld [vmem:[#allocation6 + $0x2a8] sm:$0xff]   ;;  %v2292_v21 = vld [vmem:[#allocation6 + $0x258] sm:$0xff]  }
 0x17e   : > { %2005 = vmatmul.mubr.bf16.vlgmr.msra.gmra.mrb[8].mxu0 %v555_v14  ;;  %v2287_v14 = vld [vmem:[#allocation6 + $0x288] sm:$0xff]  }
 0x17f   : > { %2013 = vmatpush3.bf16.msra.mxu1 %v2255_v13  ;;  %2044 = vmatprep.mubr.msk.bf16.mxu0 %vm2446_vm0, %v2445_v0  ;;  %v2286_v13 = vld [vmem:[#allocation6 + $0x240] sm:$0xff]  }
 0x180   : > { %2014 = vmatprep.subr.bf16.mxu1 %v2445_v0  ;;  %2029 = vmatpush3.bf16.msra.mxu0 %v2261_v23  ;;  %v2294_v23 = vld [vmem:[#allocation6 + $0x260] sm:$0xff]  }
 0x181   : > { %2030 = vmatprep.subr.bf16.mxu0 %v2445_v0 }
 0x183   : > { %2015 = vmatpush3.bf16.msra.mxu1 %v2256_v15  ;;  %v2288_v15 = vld [vmem:[#allocation6 + $0x248] sm:$0xff]  }
 0x184   : > { %2016 = vmatprep.subr.bf16.mxu1 %v2445_v0  ;;  %2031 = vmatpush3.bf16.msra.mxu0 %v2263_v25  ;;  %v2296_v25 = vld [vmem:[#allocation6 + $0x268] sm:$0xff]  }
 0x185   : > { %2032 = vmatprep.subr.bf16.mxu0 %v2445_v0 }
 0x187   : > { %2017 = vmatpush3.bf16.msra.mxu1 %v2257_v16  ;;  %v2289_v16 = vld [vmem:[#allocation6 + $0x290] sm:$0xff]  }
 0x188   : > { %2018 = vmatprep.subr.bf16.mxu1 %v2445_v0  ;;  %2033 = vmatpush3.bf16.msra.mxu0 %v2265_v27  ;;  %v2300_v27 = vld [vmem:[#allocation6 + $0x278] sm:$0xff]  }
 0x189   : > { %2034 = vmatprep.subr.bf16.mxu0 %v2445_v0 }
 0x18b   : > { %2019 = vmatpush3.bf16.msra.mxu1 %v2258_v17  ;;  %v2290_v17 = vld [vmem:[#allocation6 + $0x250] sm:$0xff]  }
 0x18c   : > { %2020 = vmatprep.subr.bf16.mxu1 %v2445_v0  ;;  %2035 = vmatpush3.bf16.msra.mxu0 %v2267_v29 }
 0x18d   : > { %2036 = vmatprep.subr.bf16.mxu0 %v2445_v0 }
 0x18f   : > { %2021 = vmatpush3.bf16.msra.mxu1 %v2259_v18  ;;  %v2291_v18 = vld [vmem:[#allocation6 + $0x298] sm:$0xff]  }
 0x190   : > { %2022 = vmatprep.subr.bf16.mxu1 %v2445_v0  ;;  %2037 = vmatpush3.bf16.msra.mxu0 %v2269_v30 }
 0x191   : > { %2038 = vmatprep.subr.bf16.mxu0 %v2445_v0 }
 0x193   : > { %2023 = vmatpush3.bf16.msra.mxu1 %v2260_v19  ;;  %v2293_v19 = vld [vmem:[#allocation6 + $0x2a0] sm:$0xff]  }
 0x194   : > { %2048 = vmatprep.subr.bf16.mxu1 %v2445_v0  ;;  %2039 = vmatpush3.bf16.msra.mxu0 %v2271_v31 }
 0x195   : > { %2040 = vmatprep.subr.bf16.mxu0 %v2445_v0 }
 0x196   : > { %2025 = vmatmul.mubr.bf16.vlgmr.msra.gmra.mrb[8].mxu1 %v773_v22  ;;  %v2297_v22 = vld [vmem:[#allocation6 + $0x2b0] sm:$0xff]  }
 0x197   : > { %2064 = vmatprep.mubr.msk.bf16.mxu1 %vm2446_vm0, %v2445_v0  ;;  %2049 = vmatpush3.bf16.msra.mxu1 %v2262_v24  ;;  %v2299_v24 = vld [vmem:[#allocation6 + $0x2b8] sm:$0xff]  }
 0x198   : > { %2050 = vmatprep.subr.bf16.mxu1 %v2445_v0  ;;  %2041 = vmatpush3.bf16.msra.mxu0 %v2273_v33 }
 0x199   : > { %2042 = vmatprep.subr.bf16.mxu0 %v2445_v0 }
 0x19b   : > { %2051 = vmatpush3.bf16.msra.mxu1 %v2264_v26  ;;  %v2298_v26 = vld [vmem:[#allocation6 + $0x270] sm:$0xff]  }
 0x19c   : > { %2052 = vmatprep.subr.bf16.mxu1 %v2445_v0  ;;  %2043 = vmatpush3.bf16.msra.mxu0 %v2275_v35 }
 0x19d   : > { %2068 = vmatprep.subr.bf16.mxu0 %v2445_v0 }
 0x19f   : > { %2053 = vmatpush3.bf16.msra.mxu1 %v2266_v28 }
 0x1a0   : > { %2054 = vmatprep.subr.bf16.mxu1 %v2445_v0 }
 0x1a3   : > { %2055 = vmatpush3.bf16.msra.mxu1 %v2268_v32 }
 0x1a4   : > { %2056 = vmatprep.subr.bf16.mxu1 %v2445_v0 }
 0x1a7   : > { %2057 = vmatpush3.bf16.msra.mxu1 %v2270_v34 }
 0x1a8   : > { %2058 = vmatprep.subr.bf16.mxu1 %v2445_v0 }
 0x1ab   : > { %2059 = vmatpush3.bf16.msra.mxu1 %v2272_v36 }
 0x1ac   : > { %2060 = vmatprep.subr.bf16.mxu1 %v2445_v0 }
 0x1af   : > { %2061 = vmatpush3.bf16.msra.mxu1 %v2274_v37 }
 0x1b0   : > { %2062 = vmatprep.subr.bf16.mxu1 %v2445_v0 }
 0x1b3   : > { %2063 = vmatpush3.bf16.msra.mxu1 %v2276_v38 }
 0x1b4   : > { %2088 = vmatprep.subr.bf16.mxu1 %v2445_v0 }
 0x249   : > { %v675_v39 = vpop.f32.mrb[4].mxu1 }
 0x24a   : > { %v1986_v40 = vpop.f32.mrb[5].mxu1 }
 0x24b   : > { %v678_v41 = vpop.f32.mrb[6].mxu1 }
 0x24c   : > { %v1987_v42 = vpop.f32.mrb[7].mxu1 }
 0x251   : > { %v764_v43 = vpop.f32.mrb[8].mxu0 }
 0x252   : > { %v765_v44 = vadd.f32 %v764_v43, %v675_v39  ;;  %v2006_v45 = vpop.f32.mrb[9].mxu0  ;;  %v1766_v39 = vld [vmem:[%s2816_s2 + $0x2] ss:$0 sm:$0xff] }
 0x253   : > { %v767_v46 = vpop.f32.mrb[10].mxu0 }
 0x254   : > { %v768_v47 = vadd.f32 %v767_v46, %v678_v41  ;;  %v2007_v48 = vpop.f32.mrb[11].mxu0 }
 0x269   : > { %v873_v49 = vpop.f32.mrb[8].mxu1 }
 0x26a   : > { %v880_v51 = vadd.f32 %v873_v49, %v765_v44  ;;  %v2026_v52 = vpop.f32.mrb[9].mxu1  ;;  %v2301_v49 = vld [vmem:[#allocation6 + $0x2c0] sm:$0xff]  }
 0x26b   : > { %v876_v53 = vpop.f32.mrb[10].mxu1 }
 0x26c   : > { %v890_v54 = vadd.f32 %v1740_v50, %v880_v51  ;;  %v881_v55 = vadd.f32 %v876_v53, %v768_v47  ;;  %v2027_v56 = vpop.f32.mrb[11].mxu1  ;;  %v2302_v51 = vld [vmem:[#allocation6 + $0x2c8] sm:$0xff]  }
 0x26d   : > { %v2304_v56 = vld [vmem:[#allocation6 + $0x2d8] sm:$0xff]  }
 0x26e   : > { %v892_v57 = vmax.f32 %v890_v54, 0.0  ;;  %v891_v58 = vadd.f32 %v1740_v50, %v881_v55  ;;  %v2303_v54 = vld [vmem:[#allocation6 + $0x2d0] sm:$0xff]  }
 0x270   : > { %894 = vst [vmem:[#allocation2 + $0x1] sm:$0xff] %v892_v57  ;;  %v893_v59 = vmax.f32 %v891_v58, 0.0  ;;  %v2306_v58 = vld [vmem:[#allocation6 + $0x2e8] sm:$0xff]  }
 0x272   : > { %895 = vst [vmem:[#allocation2 + $0x9] sm:$0xff] %v893_v59  ;;  %v918_v61 = vpack.c.bf16 %v893_v59, %v892_v57  ;;  %v2305_v57 = vld [vmem:[#allocation6 + $0x2e0] sm:$0xff]   ;;  %v2307_v59 = vld [vmem:[#allocation6 + $0x2f0] sm:$0xff]  }
 0x274   : > { %2045 = vmatmul.mubr.bf16.vlgmr.msra.gmra.mrb[12].mxu0 %v918_v61 }
 0x275   : > { %2069 = vmatpush3.bf16.msra.mxu0 %v2277_v60  ;;  %2084 = vmatprep.mubr.msk.bf16.mxu0 %vm2446_vm0, %v2445_v0  ;;  %v2308_v60 = vld [vmem:[#allocation6 + $0x2f8] sm:$0xff]  }
 0x276   : > { %2070 = vmatprep.subr.bf16.mxu0 %v2445_v0 }
 0x277   : > { %v896_v63 = vld [vmem:[#allocation2] sm:$0xff] }
 0x279   : > { %v897_v1 = vld [vmem:[#allocation2 + $0x8] sm:$0xff]  ;;  %2071 = vmatpush3.bf16.msra.mxu0 %v2278_v62 }
 0x27a   : > { %v898_v3 = vpack.c.bf16 %v897_v1, %v896_v63  ;;  %2072 = vmatprep.subr.bf16.mxu0 %v2445_v0  ;;  %v1114_v9 = vld [vmem:[#allocation2 + $0x2] sm:$0xff]  ;;  %v1115_v10 = vld [vmem:[#allocation2 + $0xa] sm:$0xff] }
 0x27b   : > { %v1116_v11 = vpack.c.bf16 %v1115_v10, %v1114_v9 }
 0x27c   : > { %2065 = vmatmul.mubr.bf16.vlgmr.msra.gmra.mrb[12].mxu1 %v898_v3 }
 0x27d   : > { %2073 = vmatpush3.bf16.msra.mxu0 %v2279_v2  ;;  %2104 = vmatprep.mubr.msk.bf16.mxu1 %vm2446_vm0, %v2445_v0 }
 0x27e   : > { %2074 = vmatprep.subr.bf16.mxu0 %v2445_v0  ;;  %2089 = vmatpush3.bf16.msra.mxu1 %v2285_v12 }
 0x27f   : > { %2090 = vmatprep.subr.bf16.mxu1 %v2445_v0 }
 0x281   : > { %2075 = vmatpush3.bf16.msra.mxu0 %v2280_v4 }
 0x282   : > { %2076 = vmatprep.subr.bf16.mxu0 %v2445_v0  ;;  %2091 = vmatpush3.bf16.msra.mxu1 %v2287_v14 }
 0x283   : > { %2092 = vmatprep.subr.bf16.mxu1 %v2445_v0 }
 0x285   : > { %2077 = vmatpush3.bf16.msra.mxu0 %v2281_v5 }
 0x286   : > { %2078 = vmatprep.subr.bf16.mxu0 %v2445_v0  ;;  %2093 = vmatpush3.bf16.msra.mxu1 %v2289_v16 }
 0x287   : > { %2094 = vmatprep.subr.bf16.mxu1 %v2445_v0 }
 0x289   : > { %2079 = vmatpush3.bf16.msra.mxu0 %v2282_v6 }
 0x28a   : > { %2080 = vmatprep.subr.bf16.mxu0 %v2445_v0  ;;  %2095 = vmatpush3.bf16.msra.mxu1 %v2291_v18 }
 0x28b   : > { %2096 = vmatprep.subr.bf16.mxu1 %v2445_v0 }
 0x28d   : > { %2081 = vmatpush3.bf16.msra.mxu0 %v2283_v7 }
 0x28e   : > { %2082 = vmatprep.subr.bf16.mxu0 %v2445_v0  ;;  %2097 = vmatpush3.bf16.msra.mxu1 %v2293_v19 }
 0x28f   : > { %2098 = vmatprep.subr.bf16.mxu1 %v2445_v0 }
 0x291   : > { %2083 = vmatpush3.bf16.msra.mxu0 %v2284_v8 }
 0x292   : > { %2108 = vmatprep.subr.bf16.mxu0 %v2445_v0  ;;  %2099 = vmatpush3.bf16.msra.mxu1 %v2295_v20 }
 0x293   : > { %2100 = vmatprep.subr.bf16.mxu1 %v2445_v0 }
 0x294   : > { %2085 = vmatmul.mubr.bf16.vlgmr.msra.gmra.mrb[16].mxu0 %v1116_v11 }
 0x295   : > { %2124 = vmatprep.mubr.msk.bf16.mxu0 %vm2446_vm0, %v2445_v0  ;;  %2109 = vmatpush3.bf16.msra.mxu0 %v2286_v13 }
 0x296   : > { %2110 = vmatprep.subr.bf16.mxu0 %v2445_v0  ;;  %2101 = vmatpush3.bf16.msra.mxu1 %v2297_v22 }
 0x297   : > { %2102 = vmatprep.subr.bf16.mxu1 %v2445_v0 }
 0x299   : > { %2111 = vmatpush3.bf16.msra.mxu0 %v2288_v15 }
 0x29a   : > { %2112 = vmatprep.subr.bf16.mxu0 %v2445_v0  ;;  %2103 = vmatpush3.bf16.msra.mxu1 %v2299_v24 }
 0x29b   : > { %2128 = vmatprep.subr.bf16.mxu1 %v2445_v0 }
 0x29d   : > { %2113 = vmatpush3.bf16.msra.mxu0 %v2290_v17 }
 0x29e   : > { %2114 = vmatprep.subr.bf16.mxu0 %v2445_v0 }
 0x2a1   : > { %2115 = vmatpush3.bf16.msra.mxu0 %v2292_v21 }
 0x2a2   : > { %2116 = vmatprep.subr.bf16.mxu0 %v2445_v0 }
 0x2a5   : > { %2117 = vmatpush3.bf16.msra.mxu0 %v2294_v23 }
 0x2a6   : > { %2118 = vmatprep.subr.bf16.mxu0 %v2445_v0 }
 0x2a9   : > { %2119 = vmatpush3.bf16.msra.mxu0 %v2296_v25 }
 0x2aa   : > { %2120 = vmatprep.subr.bf16.mxu0 %v2445_v0 }
 0x2ad   : > { %2121 = vmatpush3.bf16.msra.mxu0 %v2298_v26 }
 0x2ae   : > { %2122 = vmatprep.subr.bf16.mxu0 %v2445_v0 }
 0x2b1   : > { %2123 = vmatpush3.bf16.msra.mxu0 %v2300_v27 }
 0x347   : > { %v1018_v28 = vpop.f32.mrb[12].mxu0 }
 0x348   : > { %v2046_v29 = vpop.f32.mrb[13].mxu0 }
 0x349   : > { %v1021_v30 = vpop.f32.mrb[14].mxu0 }
 0x34a   : > { %v2047_v31 = vpop.f32.mrb[15].mxu0 }
 0x34f   : > { %v1107_v32 = vpop.f32.mrb[12].mxu1 }
 0x350   : > { %v1108_v33 = vadd.f32 %v1107_v32, %v1018_v28  ;;  %v2066_v34 = vpop.f32.mrb[13].mxu1 }
 0x351   : > { %v1110_v35 = vpop.f32.mrb[14].mxu1 }
 0x352   : > { %v1111_v36 = vadd.f32 %v1110_v35, %v1021_v30  ;;  %v2067_v37 = vpop.f32.mrb[15].mxu1 }
 0x367   : > { %v1216_v38 = vpop.f32.mrb[16].mxu0 }
 0x368   : > { %v1223_v40 = vadd.f32 %v1216_v38, %v1108_v33  ;;  %v2086_v41 = vpop.f32.mrb[17].mxu0 }
 0x369   : > { %v1219_v42 = vpop.f32.mrb[18].mxu0 }
 0x36a   : > { %v1233_v43 = vadd.f32 %v1766_v39, %v1223_v40  ;;  %v1224_v44 = vadd.f32 %v1219_v42, %v1111_v36  ;;  %v2087_v45 = vpop.f32.mrb[19].mxu0 }
 0x36c   : > { %v1235_v46 = vmax.f32 %v1233_v43, 0.0  ;;  %v1234_v47 = vadd.f32 %v1766_v39, %v1224_v44 }
 0x36e   : > { %1237 = vst [vmem:[#allocation2 + $0x1] sm:$0xff] %v1235_v46  ;;  %v1236_v48 = vmax.f32 %v1234_v47, 0.0 }
 0x370   : > { %1238 = vst [vmem:[#allocation2 + $0x9] sm:$0xff] %v1236_v48  ;;  %v1261_v50 = vpack.c.bf16 %v1236_v48, %v1235_v46 }
 0x372   : > { %2105 = vmatmul.mubr.bf16.vlgmr.msra.gmra.mrb[16].mxu1 %v1261_v50 }
 0x373   : > { %2129 = vmatpush3.bf16.msra.mxu1 %v2301_v49  ;;  %2144 = vmatprep.mubr.msk.bf16.mxu1 %vm2446_vm0, %v2445_v0 }
 0x374   : > { %2130 = vmatprep.subr.bf16.mxu1 %v2445_v0 }
 0x375   : > { %v1239_v52 = vld [vmem:[#allocation2] sm:$0xff] }
 0x377   : > { %v1240_v53 = vld [vmem:[#allocation2 + $0x8] sm:$0xff]  ;;  %2131 = vmatpush3.bf16.msra.mxu1 %v2302_v51 }
 0x378   : > { %v1241_v55 = vpack.c.bf16 %v1240_v53, %v1239_v52  ;;  %2132 = vmatprep.subr.bf16.mxu1 %v2445_v0  ;;  %v1457_v61 = vld [vmem:[#allocation2 + $0x2] sm:$0xff]  ;;  %v1458_v62 = vld [vmem:[#allocation2 + $0xa] sm:$0xff] }
 0x379   : > { %v1459_v63 = vpack.c.bf16 %v1458_v62, %v1457_v61 }
 0x37a   : > { %2125 = vmatmul.mubr.bf16.vlgmr.msra.gmra.mrb[20].mxu0 %v1241_v55 }
 0x37b   : > { %2133 = vmatpush3.bf16.msra.mxu1 %v2303_v54 }
 0x37c   : > { %2134 = vmatprep.subr.bf16.mxu1 %v2445_v0 }
 0x37f   : > { %2135 = vmatpush3.bf16.msra.mxu1 %v2304_v56 }
 0x380   : > { %2136 = vmatprep.subr.bf16.mxu1 %v2445_v0 }
 0x383   : > { %2137 = vmatpush3.bf16.msra.mxu1 %v2305_v57 }
 0x384   : > { %2138 = vmatprep.subr.bf16.mxu1 %v2445_v0 }
 0x387   : > { %2139 = vmatpush3.bf16.msra.mxu1 %v2306_v58 }
 0x388   : > { %2140 = vmatprep.subr.bf16.mxu1 %v2445_v0 }
 0x38b   : > { %2141 = vmatpush3.bf16.msra.mxu1 %v2307_v59 }
 0x38c   : > { %2142 = vmatprep.subr.bf16.mxu1 %v2445_v0  ;;  %v1792_v0 = vld [vmem:[%s2816_s2 + $0x3] ss:$0 sm:$0xff] }
 0x38f   : > { %2143 = vmatpush3.bf16.msra.mxu1 %v2308_v60 }
 0x392   : > { %2145 = vmatmul.mubr.bf16.vlgmr.msra.gmra.mrb[20].mxu1 %v1459_v63 }
 0x445   : > { %v1361_v1 = vpop.f32.mrb[16].mxu1 }
 0x446   : > { %v2106_v2 = vpop.f32.mrb[17].mxu1 }
 0x447   : > { %v1364_v3 = vpop.f32.mrb[18].mxu1 }
 0x448   : > { %v2107_v4 = vpop.f32.mrb[19].mxu1 }
 0x44d   : > { %v1450_v5 = vpop.f32.mrb[20].mxu0 }
 0x44e   : > { %v1451_v6 = vadd.f32 %v1450_v5, %v1361_v1  ;;  %v2126_v7 = vpop.f32.mrb[21].mxu0 }
 0x44f   : > { %v1453_v8 = vpop.f32.mrb[22].mxu0 }
 0x450   : > { %v1454_v9 = vadd.f32 %v1453_v8, %v1364_v3  ;;  %v2127_v10 = vpop.f32.mrb[23].mxu0 }
 0x465   : > { %v1559_v11 = vpop.f32.mrb[20].mxu1 }
 0x466   : > { %v1566_v12 = vadd.f32 %v1559_v11, %v1451_v6  ;;  %v2146_v13 = vpop.f32.mrb[21].mxu1 }
 0x467   : > { %v1562_v14 = vpop.f32.mrb[22].mxu1 }
 0x468   : > { %v1576_v15 = vadd.f32 %v1792_v0, %v1566_v12  ;;  %v1567_v16 = vadd.f32 %v1562_v14, %v1454_v9  ;;  %v2147_v17 = vpop.f32.mrb[23].mxu1 }
 0x46a   : > { %v1578_v18 = vmax.f32 %v1576_v15, 0.0  ;;  %v1577_v19 = vadd.f32 %v1792_v0, %v1567_v16 }
 0x46c   : > { %1580 = vst [vmem:[%s203_s27] sm:$0xff] %v1578_v18  ;;  %v1579_v20 = vmax.f32 %v1577_v19, 0.0 }
 0x46e   : > { %1581 = vst [vmem:[%s203_s27 + $0x8] sm:$0xff] %v1579_v20 }
 0x46f   : > { %2380 = shalt.err (!%p2377_p7)
}
 0x470   : > { %s2381_s20 = scalar_lea.hbm %s2770_s22, 256  ;;  %s2385_s26 = scalar_lea.hbm %s2817_s3, 512 }
 0x471   : > { %p2382_p9 = scmp.ne.s32.totalorder %s2770_s22, %s2381_s20  ;;  %p2386_p5 = scmp.lt.u32.totalorder %s2770_s22, %s2817_s3 }
 0x472   : > { %p2387_p11 = scmp.lt.u32.totalorder %s2385_s26, %s2381_s20  ;;  %p2389_p4 = scmp.lt.u32.totalorder %s2381_s20, %s2770_s22 }
 0x473   : > { %p2383_p2 = pnand %p2382_p9, %p2561_p12 }
 0x474   : > { %p2388_p1 = por %p2387_p11, %p2386_p5 }
 0x475   : > { %p2384_p0 = pneg %p2383_p2 }
 0x476   : > { %p2390_p6 = por %p2389_p4, %p2388_p1 }
 0x478   : > { %p2391_p8 = pnand %p2390_p6, %p2384_p0 }
 0x47a   : > { %2394 = shalt.err (!%p2391_p8)
}
 0x47b   : > { %s2448_s11 = smov 128   ;;  %s2449_s27 = smov 8  }
 0x47c   : > { %2154 = dma.vmem_to_hbm [thread:$0]  (%p2561_p12), %s2765_s28, 256, %s2770_s22, %s1583_s7, %s2448_s11, %s2448_s11, %s2449_s27  }
 0x47d PF: > { %s1611_s29 = sand.u32 1, %s2425_s12   ;;  %p2832_p10 = scmp.ne.s32.totalorder %s2822_s19, 0 }
 0x47e   : > { %p2833_p13 = scmp.ge.s32.totalorder %s2437_s15, 2  ;;  %s1612_s23 = scalar_lea.sflag [#allocation5], %s1611_s29 }
 0x480   : > { %p2165_p3 = pnand %p2833_p13, %p2832_p10 }
 0x482   : > { %2420 = dma.done.wait (!%p2165_p3), %s1612_s23, 256  }
 0x483   : > { %2422 = vsyncadd (!%p2165_p3), %s1612_s23, 4294967040  ;;  %p17_p7 = scmp.ge.s32.totalorder %s2526_s24, 4   ;;  %s2834_s12 = smov %s2429_s13 }
 0x484   : > { %s2835_s13 = smov %s2433_s14  ;;  %s2836_s14 = smov %s2557_s17 }
 0x485   : > { %s2837_s15 = smov %s2526_s24  ;;  %19 = sbr.rel (!%p17_p7) target bundleno = 6 (0x6), region = 95 }
 0x48c   :  { %1617 = vsyncpa [#allocation4], 1 }
 0x48d   :  { %1619 = vsyncpa [#allocation4 + $0x1], 1 }
 0x48e   :  { %1620 = vsyncpa [#allocation7], 1 }
 0x48f   :  { %1621 = vsyncpa [#allocation5], 1 }
 0x490   :  { %1623 = vsyncpa [#allocation5 + $0x1], 1 }

</bundles_post_ra>
